<compile_context>
chip_gen: v7x
topology: tpu7x:2x2x1
jax: 0.10.0
libtpu: 0.0.40
codegen_flags: <defaults>
</compile_context>

<pallas_src>
from functools import partial

import jax
import jax.numpy as jnp
from jax.experimental import pallas as pl
from jax.experimental.pallas import tpu as pltpu


def attention_kernel(emb_ref, hid_ref, enc_ref, w_attn_ref, w_comb_ref, out_ref):
    # Block shapes (per grid point = one batch element, one block of steps):
    #   emb_ref    : (S_blk, E)
    #   hid_ref    : (2, S_blk, H)      [0] == hidden[-2], [1] == hidden[-1]
    #   enc_ref    : (MAX_LEN, 2H)      rows >= L are zero-padded
    #   w_attn_ref : (2H + E, MAX_LEN)  (transposed torch Linear weight)
    #   w_comb_ref : (E + 2H, E)
    #   out_ref    : (S_blk, E)
    emb = emb_ref[...]                                   # (S_blk, E)
    hid = hid_ref[...]                                   # (2, S_blk, H)
    h_fwd = hid[0]                                       # (S_blk, H)
    h_bwd = hid[1]                                       # (S_blk, H)
    h_dim = hid_ref.shape[-1]
    e_dim = emb_ref.shape[-1]

    # attn Linear (no bias) as split-weight MXU accumulation — equivalent to
    # cat((hidden[-2], hidden[-1], embedded), 1) @ W_attn^T without any concat.
    logits = (
        jnp.dot(h_fwd, w_attn_ref[:h_dim, :], preferred_element_type=jnp.float32)
        + jnp.dot(h_bwd, w_attn_ref[h_dim:2 * h_dim, :], preferred_element_type=jnp.float32)
        + jnp.dot(emb, w_attn_ref[2 * h_dim:, :], preferred_element_type=jnp.float32)
    )                                                    # (S_blk, MAX_LEN)

    # Exact softmax over the full max_length axis (torch: softmax THEN slice).
    mx = jnp.max(logits, axis=-1, keepdims=True)
    ex = jnp.exp(logits - mx)
    probs = ex / jnp.sum(ex, axis=-1, keepdims=True)     # (S_blk, MAX_LEN)

    # bmm(attn_weights[:, :, :L], encoder_outputs.transpose(0,1)) — enc rows
    # beyond L are zero, so this is a single full-width MXU matmul (no slice,
    # no renormalization — matches the PyTorch semantics exactly).
    attn_applied = jnp.dot(probs, enc_ref[...],
                           preferred_element_type=jnp.float32)  # (S_blk, 2H)

    # attn_combine Linear as split-weight accumulation — equivalent to
    # cat((embedded, attn_applied), 1) @ W_comb^T, then ReLU.
    y = (
        jnp.dot(emb, w_comb_ref[:e_dim, :], preferred_element_type=jnp.float32)
        + jnp.dot(attn_applied, w_comb_ref[e_dim:, :], preferred_element_type=jnp.float32)
    )                                                    # (S_blk, E)
    out_ref[...] = jnp.maximum(y, 0.0)


def prepare_attention_params(encoder_outputs, w_attn, w_combine, max_length):
    """One-time layout prep, hoisted out of the decode loop.

    encoder_outputs: (L, B, 2H) -> (B, MAX_LEN, 2H), zero-padded past L.
    w_attn:    (max_length, 2H+E) torch Linear layout -> (2H+E, max_length)
    w_combine: (E, E+2H)          torch Linear layout -> (E+2H, E)
    """
    L = encoder_outputs.shape[0]
    assert L <= max_length, "encoder length must be <= max_length"
    enc_bld = jnp.transpose(encoder_outputs, (1, 0, 2))          # (B, L, 2H)
    enc_pad = jnp.pad(enc_bld, ((0, 0), (0, max_length - L), (0, 0)))
    return enc_pad, jnp.transpose(w_attn), jnp.transpose(w_combine)


@partial(jax.jit, static_argnames=("steps_per_block",))
def attention_forward_steps(embedded_steps, hidden_steps, enc_pad, w_attn_t,
                            w_comb_t, *, steps_per_block=None):
    """Fused multi-step forward.

    embedded_steps: (S, B, E)      one embedded input per decode step
    hidden_steps:   (S, 2, B, H)   (hidden[-2], hidden[-1]) per decode step
    enc_pad / w_attn_t / w_comb_t: from prepare_attention_params
    returns:        (S, B, E)
    """
    S, B, E = embedded_steps.shape
    H = hidden_steps.shape[-1]
    max_len, two_h = enc_pad.shape[1], enc_pad.shape[2]

    if steps_per_block is None:
        steps_per_block = S
    assert S % steps_per_block == 0, "steps_per_block must divide S"
    assert steps_per_block == S or steps_per_block % 8 == 0, \
        "steps_per_block must be S or a multiple of 8 (sublane tiling)"

    # Batch-major layout so each grid point sees a dense (steps, feature) slab.
    # These transposes run once per fused call (amortized over all steps).
    emb_bse = jnp.transpose(embedded_steps, (1, 0, 2))           # (B, S, E)
    hid_b2sh = jnp.transpose(hidden_steps, (2, 1, 0, 3))         # (B, 2, S, H)

    grid = (B, S // steps_per_block)

    out_bse = pl.pallas_call(
        attention_kernel,
        grid=grid,
        in_specs=[
            pl.BlockSpec((None, steps_per_block, E), lambda b, s: (b, s, 0)),
            pl.BlockSpec((None, 2, steps_per_block, H), lambda b, s: (b, 0, s, 0)),
            # Encoder outputs: re-fetched only when the batch index changes.
            pl.BlockSpec((None, max_len, two_h), lambda b, s: (b, 0, 0)),
            # Weight slabs: constant index_map -> DMA'd once, VMEM-resident
            # across the whole grid.  (Tiny here; for v7x keep resident data
            # comfortably under the 64 MiB/TC VMEM budget.)
            pl.BlockSpec((two_h + E, max_len), lambda b, s: (0, 0)),
            pl.BlockSpec((E + two_h, E), lambda b, s: (0, 0)),
        ],
        out_specs=pl.BlockSpec((None, steps_per_block, E), lambda b, s: (b, s, 0)),
        out_shape=jax.ShapeDtypeStruct((B, S, E), jnp.float32),
        compiler_params=pltpu.CompilerParams(
            dimension_semantics=("parallel", "parallel")),
    )(emb_bse, hid_b2sh, enc_pad, w_attn_t, w_comb_t)

    return jnp.transpose(out_bse, (1, 0, 2))                     # (S, B, E)


def attention_forward(embedded, hidden, enc_pad, w_attn_t, w_comb_t):
    """Single decode step, original module API: embedded (B, E), hidden (>=2, B, H)."""
    emb_steps = embedded[None]                                   # (1, B, E)
    hid_steps = hidden[-2:][None]                                # (1, 2, B, H)
    return attention_forward_steps(emb_steps, hid_steps, enc_pad, w_attn_t,
                                   w_comb_t)[0]


if __name__ == "__main__":
    # Small, forward-consistent shapes (bidirectional=True), S fused decode steps.
    B, E, H, MAX_LEN, L, S = 4, 32, 32, 16, 8, 16

    key = jax.random.PRNGKey(0)
    k1, k2, k3, k4, k5 = jax.random.split(key, 5)
    embedded_steps  = jax.random.normal(k1, (S, B, E), jnp.float32)
    hidden_steps    = jax.random.normal(k2, (S, 2, B, H), jnp.float32)
    encoder_outputs = jax.random.normal(k3, (L, B, 2 * H), jnp.float32)
    # Deterministic synthetic parameters (torch Linear weight layout: (out, in))
    w_attn    = jax.random.normal(k4, (MAX_LEN, 2 * H + E), jnp.float32) * 0.1
    w_combine = jax.random.normal(k5, (E, E + 2 * H), jnp.float32) * 0.1

    # One-time layout prep (per sequence / at init, not per decode step).
    enc_pad, w_attn_t, w_comb_t = jax.block_until_ready(
        prepare_attention_params(encoder_outputs, w_attn, w_combine, MAX_LEN))

    # Fused multi-step call: grid = (B, S // steps_per_block) = (4, 2).
    out = attention_forward_steps(embedded_steps, hidden_steps, enc_pad,
                                  w_attn_t, w_comb_t, steps_per_block=8)
    out = jax.block_until_ready(out)
    assert out.shape == (S, B, E)

    # Pure-JAX reference of the exact PyTorch forward semantics, per step.
    enc_bld = jnp.transpose(encoder_outputs, (1, 0, 2))

    def ref_step(emb, h_fwd, h_bwd):
        x1 = jnp.concatenate([h_fwd, h_bwd, emb], axis=1)
        aw = jax.nn.softmax(x1 @ w_attn.T, axis=-1)[:, None, :]
        aa = jnp.matmul(aw[:, :, :L], enc_bld)[:, 0, :]
        return jax.nn.relu(jnp.concatenate([emb, aa], axis=1) @ w_combine.T)

    ref = jax.vmap(ref_step)(embedded_steps, hidden_steps[:, 0], hidden_steps[:, 1])
    assert jnp.allclose(out, ref, atol=1e-4, rtol=1e-4), "fused-steps mismatch vs reference"

    # Single-step (original module API) path.
    out0 = jax.block_until_ready(
        attention_forward(embedded_steps[0], hidden_steps[0], enc_pad,
                          w_attn_t, w_comb_t))
    assert jnp.allclose(out0, ref[0], atol=1e-4, rtol=1e-4), "single-step mismatch vs reference"

    print("KERNEL_OK")
</pallas_src>

<mosaic_0001>
module attributes {stable_mosaic.version = 11 : i64} {
  func.func @attention_kernel(%arg0: i32, %arg1: i32, %arg2: memref<1x8x32xf32, #tpu.memory_space<vmem>>, %arg3: memref<1x2x8x32xf32, #tpu.memory_space<vmem>>, %arg4: memref<1x16x64xf32, #tpu.memory_space<vmem>>, %arg5: memref<96x16xf32, #tpu.memory_space<vmem>>, %arg6: memref<96x32xf32, #tpu.memory_space<vmem>>, %arg7: memref<1x8x32xf32, #tpu.memory_space<vmem>>) attributes {dimension_semantics = [#tpu.dimension_semantics<parallel>, #tpu.dimension_semantics<parallel>], iteration_bounds = array<i64: 4, 2>, scalar_prefetch = 0 : i64, scratch_operands = 0 : i64, tpu.core_type = #tpu.core_type<tc>, window_params = [{transform_indices = @transform_0, window_bounds = array<i64: 1, 8, 32>}, {transform_indices = @transform_1, window_bounds = array<i64: 1, 2, 8, 32>}, {transform_indices = @transform_2, window_bounds = array<i64: 1, 16, 64>}, {pipeline_mode = #tpu.pipeline_mode<synchronous>, transform_indices = @transform_3, window_bounds = array<i64: 96, 16>}, {pipeline_mode = #tpu.pipeline_mode<synchronous>, transform_indices = @transform_4, window_bounds = array<i64: 96, 32>}, {transform_indices = @transform_5, window_bounds = array<i64: 1, 8, 32>}]} {
    %c0 = arith.constant 0 : index
    %c0_0 = arith.constant 0 : index
    %c0_1 = arith.constant 0 : index
    %0 = vector.load %arg2[%c0, %c0_0, %c0_1] : memref<1x8x32xf32, #tpu.memory_space<vmem>>, vector<1x8x32xf32>
    %1 = vector.shape_cast %0 : vector<1x8x32xf32> to vector<8x32xf32>
    %c0_2 = arith.constant 0 : index
    %c0_3 = arith.constant 0 : index
    %c0_4 = arith.constant 0 : index
    %c0_5 = arith.constant 0 : index
    %2 = vector.load %arg3[%c0_2, %c0_3, %c0_4, %c0_5] : memref<1x2x8x32xf32, #tpu.memory_space<vmem>>, vector<1x2x8x32xf32>
    %3 = vector.shape_cast %2 : vector<1x2x8x32xf32> to vector<2x8x32xf32>
    %4 = vector.extract_strided_slice %3 {offsets = [0, 0, 0], sizes = [1, 8, 32], strides = [1, 1, 1]} : vector<2x8x32xf32> to vector<1x8x32xf32>
    %5 = vector.shape_cast %4 : vector<1x8x32xf32> to vector<8x32xf32>
    %6 = vector.extract_strided_slice %3 {offsets = [1, 0, 0], sizes = [1, 8, 32], strides = [1, 1, 1]} : vector<2x8x32xf32> to vector<1x8x32xf32>
    %7 = vector.shape_cast %6 : vector<1x8x32xf32> to vector<8x32xf32>
    %c0_6 = arith.constant 0 : index
    %c0_7 = arith.constant 0 : index
    %8 = vector.load %arg5[%c0_6, %c0_7] : memref<96x16xf32, #tpu.memory_space<vmem>>, vector<32x16xf32>
    %cst = arith.constant dense<0.000000e+00> : vector<8x16xf32>
    %9 = tpu.matmul %5, %8, %cst {dimension_numbers = #tpu.dot_dimension_numbers<[1], [0], [0], [1], [0, 0, 1, 1], [], []>} : vector<8x32xf32>, vector<32x16xf32>, vector<8x16xf32> -> vector<8x16xf32>
    %c32 = arith.constant 32 : index
    %c0_8 = arith.constant 0 : index
    %10 = vector.load %arg5[%c32, %c0_8] : memref<96x16xf32, #tpu.memory_space<vmem>>, vector<32x16xf32>
    %cst_9 = arith.constant dense<0.000000e+00> : vector<8x16xf32>
    %11 = tpu.matmul %7, %10, %cst_9 {dimension_numbers = #tpu.dot_dimension_numbers<[1], [0], [0], [1], [0, 0, 1, 1], [], []>} : vector<8x32xf32>, vector<32x16xf32>, vector<8x16xf32> -> vector<8x16xf32>
    %12 = arith.addf %9, %11 : vector<8x16xf32>
    %c64 = arith.constant 64 : index
    %c0_10 = arith.constant 0 : index
    %13 = vector.load %arg5[%c64, %c0_10] : memref<96x16xf32, #tpu.memory_space<vmem>>, vector<32x16xf32>
    %cst_11 = arith.constant dense<0.000000e+00> : vector<8x16xf32>
    %14 = tpu.matmul %1, %13, %cst_11 {dimension_numbers = #tpu.dot_dimension_numbers<[1], [0], [0], [1], [0, 0, 1, 1], [], []>} : vector<8x32xf32>, vector<32x16xf32>, vector<8x16xf32> -> vector<8x16xf32>
    %15 = arith.addf %12, %14 : vector<8x16xf32>
    %cst_12 = arith.constant dense<0xFF800000> : vector<8xf32>
    %16 = vector.multi_reduction <maximumf>, %15, %cst_12 [1] : vector<8x16xf32> to vector<8xf32>
    %17 = vector.shape_cast %16 : vector<8xf32> to vector<8x1xf32>
    %18 = vector.broadcast %17 : vector<8x1xf32> to vector<8x16xf32>
    %19 = arith.subf %15, %18 : vector<8x16xf32>
    %20 = math.exp %19 : vector<8x16xf32>
    %cst_13 = arith.constant dense<0.000000e+00> : vector<8xf32>
    %21 = vector.multi_reduction <add>, %20, %cst_13 [1] : vector<8x16xf32> to vector<8xf32>
    %22 = vector.shape_cast %21 : vector<8xf32> to vector<8x1xf32>
    %23 = vector.broadcast %22 : vector<8x1xf32> to vector<8x16xf32>
    %24 = arith.divf %20, %23 : vector<8x16xf32>
    %c0_14 = arith.constant 0 : index
    %c0_15 = arith.constant 0 : index
    %c0_16 = arith.constant 0 : index
    %25 = vector.load %arg4[%c0_14, %c0_15, %c0_16] : memref<1x16x64xf32, #tpu.memory_space<vmem>>, vector<1x16x64xf32>
    %26 = vector.shape_cast %25 : vector<1x16x64xf32> to vector<16x64xf32>
    %cst_17 = arith.constant dense<0.000000e+00> : vector<8x64xf32>
    %27 = tpu.matmul %24, %26, %cst_17 {dimension_numbers = #tpu.dot_dimension_numbers<[1], [0], [0], [1], [0, 0, 1, 1], [], []>} : vector<8x16xf32>, vector<16x64xf32>, vector<8x64xf32> -> vector<8x64xf32>
    %c0_18 = arith.constant 0 : index
    %c0_19 = arith.constant 0 : index
    %28 = vector.load %arg6[%c0_18, %c0_19] : memref<96x32xf32, #tpu.memory_space<vmem>>, vector<32x32xf32>
    %cst_20 = arith.constant dense<0.000000e+00> : vector<8x32xf32>
    %29 = tpu.matmul %1, %28, %cst_20 {dimension_numbers = #tpu.dot_dimension_numbers<[1], [0], [0], [1], [0, 0, 1, 1], [], []>} : vector<8x32xf32>, vector<32x32xf32>, vector<8x32xf32> -> vector<8x32xf32>
    %c32_21 = arith.constant 32 : index
    %c0_22 = arith.constant 0 : index
    %30 = vector.load %arg6[%c32_21, %c0_22] : memref<96x32xf32, #tpu.memory_space<vmem>>, vector<64x32xf32>
    %cst_23 = arith.constant dense<0.000000e+00> : vector<8x32xf32>
    %31 = tpu.matmul %27, %30, %cst_23 {dimension_numbers = #tpu.dot_dimension_numbers<[1], [0], [0], [1], [0, 0, 1, 1], [], []>} : vector<8x64xf32>, vector<64x32xf32>, vector<8x32xf32> -> vector<8x32xf32>
    %32 = arith.addf %29, %31 : vector<8x32xf32>
    %cst_24 = arith.constant 0.000000e+00 : f32
    %33 = vector.broadcast %cst_24 : f32 to vector<8x32xf32>
    %34 = arith.maximumf %32, %33 : vector<8x32xf32>
    %c0_25 = arith.constant 0 : index
    %c0_26 = arith.constant 0 : index
    %c0_27 = arith.constant 0 : index
    %35 = vector.load %arg7[%c0_25, %c0_26, %c0_27] : memref<1x8x32xf32, #tpu.memory_space<vmem>>, vector<1x8x32xf32>
    %36 = vector.shape_cast %35 : vector<1x8x32xf32> to vector<8x32xf32>
    %37 = vector.shape_cast %34 : vector<8x32xf32> to vector<1x8x32xf32>
    tpu.vector_store %arg7[%c0_25, %c0_26, %c0_27], %37 {strides = array<i32>} : memref<1x8x32xf32, #tpu.memory_space<vmem>>, vector<1x8x32xf32>,
    return
  }
  func.func @transform_0(%arg0: i32, %arg1: i32) -> (i32, i32, i32) {
    %c0_i32 = arith.constant 0 : i32
    %c0_i32_0 = arith.constant 0 : i32
    return %arg0, %arg1, %c0_i32 : i32, i32, i32
  }
  func.func @transform_1(%arg0: i32, %arg1: i32) -> (i32, i32, i32, i32) {
    %c0_i32 = arith.constant 0 : i32
    %c0_i32_0 = arith.constant 0 : i32
    %c0_i32_1 = arith.constant 0 : i32
    return %arg0, %c0_i32, %arg1, %c0_i32_0 : i32, i32, i32, i32
  }
  func.func @transform_2(%arg0: i32, %arg1: i32) -> (i32, i32, i32) {
    %c0_i32 = arith.constant 0 : i32
    %c0_i32_0 = arith.constant 0 : i32
    %c0_i32_1 = arith.constant 0 : i32
    return %arg0, %c0_i32, %c0_i32_0 : i32, i32, i32
  }
  func.func @transform_3(%arg0: i32, %arg1: i32) -> (i32, i32) {
    %c0_i32 = arith.constant 0 : i32
    %c0_i32_0 = arith.constant 0 : i32
    %c0_i32_1 = arith.constant 0 : i32
    return %c0_i32, %c0_i32_0 : i32, i32
  }
  func.func @transform_4(%arg0: i32, %arg1: i32) -> (i32, i32) {
    %c0_i32 = arith.constant 0 : i32
    %c0_i32_0 = arith.constant 0 : i32
    %c0_i32_1 = arith.constant 0 : i32
    return %c0_i32, %c0_i32_0 : i32, i32
  }
  func.func @transform_5(%arg0: i32, %arg1: i32) -> (i32, i32, i32) {
    %c0_i32 = arith.constant 0 : i32
    %c0_i32_0 = arith.constant 0 : i32
    return %arg0, %arg1, %c0_i32 : i32, i32, i32
  }
}

</mosaic_0001>

<bundles_post_ra>
// kernel: attention_forward_steps.1
= control target key start
LH: loop header
LB: loop body
LE: loop exit
PB: predicated region body
PF: predicated region fallthrough
CT: control target
= control target key end

     0   :  { %s1260_s18 = smov 0   ;;  %s1262_s19 = smov 0   ;;  %s1476_s0 = inlined_call_operand.vmem [shape: f32[4,16,32], index: 0, kind: input, shape index: {}]   ;;  %s1477_s1 = inlined_call_operand.vmem [shape: f32[4,2,16,32], index: 1, kind: input, shape index: {}]   ;;  %s1478_s2 = inlined_call_operand.vmem [shape: f32[4,16,64], index: 2, kind: input, shape index: {}]   ;;  %s1479_s3 = inlined_call_operand.vmem [shape: f32[96,16], index: 3, kind: input, shape index: {}]   ;;  %s1480_s4 = inlined_call_operand.vmem [shape: f32[96,32], index: 4, kind: input, shape index: {}]   ;;  %s1481_s5 = inlined_call_operand.vmem [shape: f32[4,16,32], index: 5, kind: output, shape index: {}]  }
   0x1   :  { %s1264_s20 = smov 0   ;;  %s1266_s21 = smov 0  }
   0x2   :  { %s1268_s22 = smov 0   ;;  %s1270_s23 = smov 0  }
   0x3   :  { %s1272_s24 = smov 0  }
   0x4 LB: > { %s24_s25 = sadd.s32 1, %s1217_s22  ;;  %s27_s26 = sadd.s32 1, %s1221_s23  ;;  %s1225_s24 = sphi %s1272_s24, %s15_s24   ;;  %s1221_s23 = sphi %s1270_s23, %s1487_s23   ;;  %s1217_s22 = sphi %s1268_s22, %s1486_s22   ;;  %s1213_s21 = sphi %s1266_s21, %s1485_s21   ;;  %s1209_s20 = sphi %s1264_s20, %s1484_s20   ;;  %s1205_s19 = sphi %s1262_s19, %s1483_s19   ;;  %s1201_s18 = sphi %s1260_s18, %s1482_s18  }
   0x5   : > { %p25_p0 = scmp.ge.s32.totalorder %s24_s25, 2  ;;  %p71_p1 = scmp.ne.s32.totalorder %s1205_s19, %s1201_s18 }
   0x6   : > { %p72_p2 = scmp.eq.s32.totalorder %s1225_s24, 0  ;;  %s64_s30 = sadd.s32 1, %s1205_s19 }
   0x7   : > { %s1489_s25 = smov (%p25_p0, %s24_s25), 0  ;;  %s1491_s26 = smov (!%p25_p0, %s27_s26), %s1221_s23 }
   0x8   : > { %p73_p3 = por %p72_p2, %p71_p1  ;;  %p29_p4 = scmp.ge.s32.totalorder %s1491_s26, 4 }
   0x9   : > { %s60_s27 = ssub.s32 %s1217_s22, %s1489_s25  ;;  %p940_p6 = scmp.ge.s32.totalorder %s1225_s24, 8 }
   0xa   : > { %s1493_s26 = smov (%p29_p4, %s1491_s26), 0 }
   0xb   : > { %s59_s28 = ssub.s32 %s1221_s23, %s1493_s26  ;;  %199 = sbr.rel (%p940_p6) target bundleno = 25 (0x19), region = 24 }
   0xc   : > { %s61_s29 = sor.u32 %s60_s27, %s59_s28 }
   0xd   : > { %p62_p5 = scmp.eq.s32.totalorder %s61_s29, 0 }
   0xf   : > { %s1311_s6 = scalar_select %p62_p5, %s1205_s19, %s64_s30  }
  0x12   : > { %213 = sbr.rel (!%p73_p3) target bundleno = 25 (0x19), region = 32  ;;  %s215_s7 = sand.u32 (%p73_p3), 1, %s1205_s19  }
  0x13   : > { %s942_s8 = sshll.u32 (%p73_p3), %s1221_s23, 2  ;;  %s941_s9 = sshll.u32 (%p73_p3), %s215_s7, 4 }
  0x14   : > { %s219_s10 = sadd.s32 (%p73_p3), %s1217_s22, %s942_s8  ;;  %s217_s15 = scalar_lea.vmem (%p73_p3), [#allocation2], %s941_s9 }
  0x15   : > { %s943_s11 = sshll.u32 (%p73_p3), %s219_s10, 3 }
  0x16   : > { %s221_s14 = scalar_lea.vmem (%p73_p3), %s1477_s1, %s943_s11 }
  0x17   : > { %v251_v0 = vld [vmem:[%s221_s14] sm:$0xff] (%p73_p3)  ;;  %v253_v1 = vld [vmem:[%s221_s14 + $0x10] sm:$0xff] (%p73_p3) }
  0x18   : > { %252 = vst [vmem:[%s217_s15] sm:$0xff] (%p73_p3), %v251_v0  ;;  %254 = vst [vmem:[%s217_s15 + $0x8] sm:$0xff] (%p73_p3), %v253_v1 }
  0x19 PF: > { %p944_p7 = scmp.ge.s32.totalorder %s1225_s24, 1  ;;  %p267_p8 = scmp.lt.s32.totalorder %s1225_s24, 9 }
  0x1b   : > { %p268_p9 = pnand %p944_p7, %p267_p8 }
  0x1c   : > { %v345_v2 = vld [vmem:[%s1479_s3 + $0x20] sm:$0xff] (!%p268_p9)  ;;  %v346_v3 = vld [vmem:[%s1479_s3 + $0x28] sm:$0xff] (!%p268_p9)  ;;  %v347_v4 = vld [vmem:[%s1479_s3 + $0x30] sm:$0xff] (!%p268_p9)  ;;  %v1227_v5 = vmov (!%p268_p9), 0.0|0.0   ;;  %vm1228_vm0 = vmmov (!%p268_p9), 0   ;;  %v1229_v8 = vmov (!%p268_p9), 0.0  }
  0x1d   : > { %271 = sbr.rel (%p268_p9) target bundleno = 1015 (0x3f7), region = 74  ;;  %1063 = vmatprep.subr.bf16.mxu0 (!%p268_p9), %v1227_v5  ;;  %v1064_v6 = vpack.c.bf16 (!%p268_p9), %v346_v3, %v345_v2  ;;  %v348_v7 = vld [vmem:[%s1479_s3 + $0x38] sm:$0xff] (!%p268_p9)  ;;  %1001 = vmatprep.mubr.msk.f32.mxu0 (!%p268_p9), %vm1228_vm0, %v1229_v8  ;;  %s274_s9 = sand.u32 (!%p268_p9), 1, %s1201_s18   ;;  %v341_v10 = vld [vmem:[%s1479_s3] sm:$0xff] (!%p268_p9)  ;;  %v342_v11 = vld [vmem:[%s1479_s3 + $0x8] sm:$0xff] (!%p268_p9)  ;;  %vm349_vm1 = vcmask (!%p268_p9), 261120  }
  0x1e   : > { %s1338_s10 = sshll.u32 (!%p268_p9), %s274_s9, 4  ;;  %1081 = vmatprep.subr.bf16.mxu1 (!%p268_p9), %v1227_v5  ;;  %1030 = vmatprep.mubr.msk.f32.mxu1 (!%p268_p9), %vm1228_vm0, %v1229_v8  ;;  %v1067_v9 = vpack.c.bf16 (!%p268_p9), %v348_v7, %v347_v4  ;;  %p317_p10 = scmp.lt.s32.totalorder (!%p268_p9), %s1213_s21, 3  ;;  %v1070_v13 = vpack.c.bf16 (!%p268_p9), %v342_v11, %v341_v10  ;;  %v343_v14 = vld [vmem:[%s1479_s3 + $0x10] sm:$0xff] (!%p268_p9)  ;;  %v344_v15 = vld [vmem:[%s1479_s3 + $0x18] sm:$0xff] (!%p268_p9)  ;;  %v496_v17 = vld [vmem:[%s1479_s3 + $0x40] sm:$0xff] (!%p268_p9)  ;;  %vm574_vm2 = vcmask (!%p268_p9), 130048  }
  0x1f   : > { %1065 = vmatpush3.bf16.msra.mxu0 (!%p268_p9), %v1064_v6  ;;  %p319_p11 = scmp.lt.s32.totalorder (!%p268_p9), %s1209_s20, 1  ;;  %s276_s14 = scalar_lea.vmem (!%p268_p9), [#allocation2], %s1338_s10  ;;  %v1073_v16 = vpack.c.bf16 (!%p268_p9), %v344_v15, %v343_v14  ;;  %v497_v18 = vld [vmem:[%s1479_s3 + $0x48] sm:$0xff] (!%p268_p9)  ;;  %v498_v21 = vld [vmem:[%s1479_s3 + $0x50] sm:$0xff] (!%p268_p9)  ;;  %v499_v22 = vld [vmem:[%s1479_s3 + $0x58] sm:$0xff] (!%p268_p9)  ;;  %vm673_vm3 = vcmask (!%p268_p9), 523264  }
  0x20   : > { %1066 = vmatprep.subr.bf16.mxu0 (!%p268_p9), %v1227_v5  ;;  %v340_v12 = vld [vmem:[%s276_s14 + $0x8] sm:$0xff] (!%p268_p9)  ;;  %v339_v19 = vld [vmem:[%s276_s14] sm:$0xff] (!%p268_p9)  ;;  %v1076_v20 = vpack.c.bf16 (!%p268_p9), %v497_v18, %v496_v17  ;;  %v1079_v23 = vpack.c.bf16 (!%p268_p9), %v499_v22, %v498_v21 }
  0x21   : > { %v665_v37 = vld [vmem:[%s1480_s4 + $0x20] sm:$0xff] (!%p268_p9)  ;;  %v666_v38 = vld [vmem:[%s1480_s4 + $0x28] sm:$0xff] (!%p268_p9)  ;;  %v667_v42 = vld [vmem:[%s1480_s4 + $0x30] sm:$0xff] (!%p268_p9) }
  0x22   : > { %v1085_v40 = vpack.c.bf16 (!%p268_p9), %v666_v38, %v665_v37  ;;  %v668_v43 = vld [vmem:[%s1480_s4 + $0x38] sm:$0xff] (!%p268_p9)  ;;  %v669_v45 = vld [vmem:[%s1480_s4 + $0x40] sm:$0xff] (!%p268_p9)  ;;  %v670_v46 = vld [vmem:[%s1480_s4 + $0x48] sm:$0xff] (!%p268_p9) }
  0x23   : > { %1068 = vmatpush3.bf16.msra.mxu0 (!%p268_p9), %v1067_v9  ;;  %v1088_v44 = vpack.c.bf16 (!%p268_p9), %v668_v43, %v667_v42  ;;  %v1091_v47 = vpack.c.bf16 (!%p268_p9), %v670_v46, %v669_v45  ;;  %v671_v48 = vld [vmem:[%s1480_s4 + $0x50] sm:$0xff] (!%p268_p9)  ;;  %v672_v49 = vld [vmem:[%s1480_s4 + $0x58] sm:$0xff] (!%p268_p9)  ;;  %v661_v51 = vld [vmem:[%s1480_s4] sm:$0xff] (!%p268_p9) }
  0x24   : > { %s1495_s21 = smov (!%p317_p10, %s1213_s21), 3  ;;  %1069 = vmatprep.subr.bf16.mxu0 %v1227_v5  ;;  %s1497_s20 = smov (!%p319_p11, %s1209_s20), 1  ;;  %v1094_v50 = vpack.c.bf16 %v672_v49, %v671_v48  ;;  %v662_v52 = vld [vmem:[%s1480_s4 + $0x8] sm:$0xff]  ;;  %v663_v54 = vld [vmem:[%s1480_s4 + $0x10] sm:$0xff]  ;;  %v664_v55 = vld [vmem:[%s1480_s4 + $0x18] sm:$0xff] }
  0x25   : > { %s946_s28 = sshll.u32 %s1495_s21, 1  ;;  %s960_s16 = sshll.u32 %s1495_s21, 4  ;;  %v1097_v53 = vpack.c.bf16 %v662_v52, %v661_v51  ;;  %v1100_v58 = vpack.c.bf16 %v664_v55, %v663_v54 }
  0x26   : > { %1002 = vmatmul.mubr.msk.f32.vlgmr.msra.gmra.mrb[0].mxu0 %vm349_vm1, %v340_v12  ;;  %s1375_s9 = sadd.s32 %s946_s28, %s1497_s20  ;;  %s329_s28 = scalar_lea.vmem %s1478_s2, %s960_s16 }
  0x27   : > { %1071 = vmatpush3.bf16.msra.mxu0 %v1070_v13  ;;  %1012 = vmatprep.mubr.msk.f32.mxu0 %vm1228_vm0, %v1229_v8  ;;  %s947_s13 = sshll.u32 %s1375_s9, 3  ;;  %v586_v33 = vld [vmem:[%s329_s28] sm:$0xff]  ;;  %v587_v34 = vld [vmem:[%s329_s28 + $0x8] sm:$0xff] }
  0x28   : > { %1072 = vmatprep.subr.bf16.mxu0 %v1227_v5  ;;  %s324_s15 = scalar_lea.vmem %s1476_s0, %s947_s13  ;;  %v1082_v35 = vpack.c.bf16 %v587_v34, %v586_v33  ;;  %s337_s14 = scalar_lea.vmem %s1481_s5, %s947_s13 }
  0x29   : > { %v338_v24 = vld [vmem:[%s324_s15] sm:$0xff] }
  0x2a   : > { %1083 = vmatpush3.bf16.msra.mxu1 %v1082_v35 }
  0x2b   : > { %1074 = vmatpush3.bf16.msra.mxu0 %v1073_v16  ;;  %1084 = vmatprep.subr.bf16.mxu1 %v1227_v5 }
  0x2c   : > { %1075 = vmatprep.subr.bf16.mxu0 %v1227_v5 }
  0x2e   : > { %1013 = vmatmul.mubr.msk.f32.vlgmr.msra.gmra.mrb[0].mxu0 %vm349_vm1, %v339_v19 }
  0x2f   : > { %1077 = vmatpush3.bf16.msra.mxu0 %v1076_v20  ;;  %1023 = vmatprep.mubr.msk.f32.mxu0 %vm1228_vm0, %v1229_v8 }
  0x30   : > { %1078 = vmatprep.subr.bf16.mxu0 %v1227_v5 }
  0x33   : > { %1080 = vmatpush3.bf16.msra.mxu0 %v1079_v23 }
  0x36   : > { %1024 = vmatmul.mubr.msk.f32.vlgmr.msra.gmra.mrb[0].mxu0 %vm349_vm1, %v338_v24 }
 0x109   : > { %v569_v25 = vpop.f32.mrb[0].mxu0 }
 0x10a   : > { %v1025_v26 = vpop.f32.mrb[1].mxu0  ;;  %v575_v27 = vsel %vm574_vm2, %v569_v25, -inf }
 0x10b   : > { %576 = vmax.xlane.f32.xlu0 %v575_v27 }
 0x198   : > { %v577_v28 = vpop.xlane.xlu0 %576 }
 0x199   : > { %v578_v29 = vsub.f32 %v569_v25, %v577_v28 }
 0x19b   : > { %v579_v30 = vmul.f32 1.442695, %v578_v29 }
 0x19d   : > { %1167 = vpow2.f32 %v579_v30 }
 0x1a7   : > { %v1168_v31 = vpop.eup %1167 }
 0x1a8   : > { %v581_v32 = vsel %vm574_vm2, %v1168_v31, 0.0 }
 0x1a9   : > { %582 = vadd.xlane.f32.xlu0 %v581_v32 }
 0x236   : > { %v583_v36 = vpop.xlane.xlu0 %582 }
 0x237   : > { %1169 = vrcp.f32 %v583_v36 }
 0x241   : > { %v1170_v39 = vpop.eup %1169 }
 0x242   : > { %v585_v41 = vmul.f32 %v1170_v39, %v1168_v31 }
 0x244   : > { %1031 = vmatmul.mubr.msk.f32.vlgmr.msra.gmra.mrb[0].mxu1 %vm574_vm2, %v585_v41 }
 0x245   : > { %1086 = vmatpush3.bf16.msra.mxu1 %v1085_v40  ;;  %1049 = vmatprep.mubr.msk.f32.mxu1 %vm1228_vm0, %v1229_v8 }
 0x246   : > { %1087 = vmatprep.subr.bf16.mxu1 %v1227_v5 }
 0x249   : > { %1089 = vmatpush3.bf16.msra.mxu1 %v1088_v44 }
 0x24a   : > { %1090 = vmatprep.subr.bf16.mxu1 %v1227_v5 }
 0x24d   : > { %1092 = vmatpush3.bf16.msra.mxu1 %v1091_v47 }
 0x24e   : > { %1093 = vmatprep.subr.bf16.mxu1 %v1227_v5 }
 0x251   : > { %1095 = vmatpush3.bf16.msra.mxu1 %v1094_v50 }
 0x252   : > { %1096 = vmatprep.subr.bf16.mxu1 %v1227_v5 }
 0x317   : > { %v657_v56 = vpop.f32.mrb[0].mxu1 }
 0x318   : > { %v1032_v57 = vpop.f32.mrb[1].mxu1  ;;  %1050 = vmatmul.mubr.msk.f32.vlgmr.msra.gmra.mrb[2].mxu1 %vm673_vm3, %v657_v56 }
 0x319   : > { %1098 = vmatpush3.bf16.msra.mxu1 %v1097_v53  ;;  %1060 = vmatprep.mubr.msk.f32.mxu1 %vm1228_vm0, %v1229_v8 }
 0x31a   : > { %1099 = vmatprep.subr.bf16.mxu1 %v1227_v5 }
 0x31d   : > { %1101 = vmatpush3.bf16.msra.mxu1 %v1100_v58 }
 0x320   : > { %1061 = vmatmul.mubr.msk.f32.vlgmr.msra.gmra.mrb[2].mxu1 %vm349_vm1, %v338_v24 }
 0x3f3   : > { %v813_v59 = vpop.f32.mrb[2].mxu1 }
 0x3f4   : > { %v817_v60 = vmax.f32 %v813_v59, 0.0  ;;  %v1062_v61 = vpop.f32.mrb[3].mxu1 }
 0x3f6   : > { %818 = vst.msk [vmem:[%s337_s14] sm:$0xff] %vm349_vm1, %v817_v60 }
 0x3f7 PF: > { %s15_s24 = sadd.s32 1, %s1225_s24   ;;  %s1482_s18 = smov %s1205_s19 }
 0x3f8   : > { %p12_p12 = scmp.ge.s32.totalorder %s15_s24, 10   ;;  %s1483_s19 = smov %s1311_s6 }
 0x3f9   : > { %s1484_s20 = smov %s1217_s22  ;;  %s1485_s21 = smov %s1221_s23 }
 0x3fa   : > { %s1486_s22 = smov %s1489_s25  ;;  %s1487_s23 = smov %s1493_s26 }
 0x3fb   :  { %14 = sbr.rel (!%p12_p12) target bundleno = 4 (0x4), region = 119 }

</bundles_post_ra>
